<compile_context>
chip_gen: v7x
topology: tpu7x:2x2x1
jax: 0.10.0
libtpu: 0.0.40
codegen_flags: <defaults>
</compile_context>

<pallas_src>
import jax
import jax.numpy as jnp
from jax.experimental import pallas as pl
from jax.experimental.pallas import tpu as pltpu


def _mlp_kernel(x_ref, w1_ref, b1_ref, w2_ref, b2_ref, o_ref):
    # fc1: [tb, D_in] @ [D_in, H] -> [tb, H], f32 accumulate.
    h = jnp.dot(x_ref[...], w1_ref[...], preferred_element_type=jnp.float32)
    h = jnp.maximum(h + b1_ref[...], 0.0)                      # +bias, ReLU
    # fc2: [tb, H] @ [H, D_out] -> [tb, D_out]
    out = jnp.dot(h, w2_ref[...], preferred_element_type=jnp.float32)
    out = out + b2_ref[...]
    o_ref[...] = out.astype(o_ref.dtype)


def _round_up(v, m):
    return ((v + m - 1) // m) * m


def simple_model_forward(x, w1, b1, w2, b2, *, block_b=16384):
    """x: [B, D_in]; w1: [D_in, H]; b1: [H]; w2: [H, D_out]; b2: [D_out].

    Returns [B, D_out] == relu(x @ w1 + b1) @ w2 + b2
    (PyTorch fc2(relu(fc1(x))) with weights stored as [in, out]).
    """
    B, D_in = x.shape
    H = w1.shape[1]
    D_out = w2.shape[1]
    itemsize = jnp.dtype(x.dtype).itemsize

    # ---- Batch tile selection -------------------------------------------------
    # Sublane granularity is 8. Cap the tile so the lane-padded (last dim pads
    # to 128), double-buffered x and out tiles fit a ~40 MiB VMEM budget
    # (safe under v7x's 64 MiB physical / 32 MiB scoped default once we raise
    # vmem_limit_bytes; v5e/v6e have 128 MiB).
    vmem_budget = 40 * 1024 * 1024
    max_tb_vmem = (vmem_budget // (4 * 128 * 4)) // 8 * 8   # 4 buffers * 128 lanes * 4 B
    tb = min(block_b, max_tb_vmem, max(_round_up(B, 8), 8))
    tb = max(_round_up(tb, 8), 8)

    b_pad = _round_up(max(B, 1), tb)
    n_steps = b_pad // tb      # >= 2 automatically when B > tb (v7x megacore)

    # Pad batch only if needed (no extra HBM pass when B is tile-aligned).
    if b_pad != B:
        x_in = jnp.zeros((b_pad, D_in), x.dtype).at[:B].set(x)
    else:
        x_in = x

    b1_r = b1.reshape(1, H)
    b2_r = b2.reshape(1, D_out)

    cost = pl.CostEstimate(
        flops=2 * b_pad * (D_in * H + H * D_out),
        transcendentals=0,
        bytes_accessed=itemsize * (b_pad * D_in + b_pad * D_out)
        + 4 * (D_in * H + H + H * D_out + D_out),
    )

    # Scoped VMEM: double-buffered, lane-padded x and out tiles + small slack
    # for the resident weights/biases and compiler scratch.
    vmem_limit = max(4 * tb * 128 * 4 + (2 << 20), 16 << 20)

    out = pl.pallas_call(
        _mlp_kernel,
        out_shape=jax.ShapeDtypeStruct((b_pad, D_out), x.dtype),
        grid_spec=pl.GridSpec(
            grid=(n_steps,),
            in_specs=[
                pl.BlockSpec((tb, D_in), lambda i: (i, 0)),    # x: tiled over batch
                pl.BlockSpec((D_in, H), lambda i: (0, 0)),     # W1: VMEM-resident
                pl.BlockSpec((1, H), lambda i: (0, 0)),        # b1: VMEM-resident
                pl.BlockSpec((H, D_out), lambda i: (0, 0)),    # W2: VMEM-resident
                pl.BlockSpec((1, D_out), lambda i: (0, 0)),    # b2: VMEM-resident
            ],
            out_specs=pl.BlockSpec((tb, D_out), lambda i: (i, 0)),
        ),
        compiler_params=pltpu.CompilerParams(
            dimension_semantics=("parallel",),   # shard batch tiles across TCs (v7x)
            vmem_limit_bytes=int(vmem_limit),
        ),
        cost_estimate=cost,
    )(x_in, w1, b1_r, w2, b2_r)

    return out[:B, :]


def _init_params(key, input_dim=10, hidden_dim=20, output_dim=2):
    """Deterministic init mimicking nn.Linear's uniform(-1/sqrt(fan_in), +)."""
    k1, k2, k3, k4 = jax.random.split(key, 4)
    lim1 = 1.0 / jnp.sqrt(input_dim)
    lim2 = 1.0 / jnp.sqrt(hidden_dim)
    w1 = jax.random.uniform(k1, (input_dim, hidden_dim), jnp.float32, -lim1, lim1)
    b1 = jax.random.uniform(k2, (hidden_dim,), jnp.float32, -lim1, lim1)
    w2 = jax.random.uniform(k3, (hidden_dim, output_dim), jnp.float32, -lim2, lim2)
    b2 = jax.random.uniform(k4, (output_dim,), jnp.float32, -lim2, lim2)
    return w1, b1, w2, b2


def _reference(x, w1, b1, w2, b2):
    return jnp.maximum(x @ w1 + b1, 0.0) @ w2 + b2


if __name__ == "__main__":
    key = jax.random.PRNGKey(0)
    k_x, k_x2, k_p = jax.random.split(key, 3)

    input_dim, hidden_dim, output_dim = 10, 20, 2
    w1, b1, w2, b2 = _init_params(k_p, input_dim, hidden_dim, output_dim)

    # Small case matching the original test shape (single grid step, tb=8).
    x_small = jax.random.normal(k_x, (8, input_dim), jnp.float32)
    out_small = jax.block_until_ready(simple_model_forward(x_small, w1, b1, w2, b2))
    assert out_small.shape == (8, output_dim)
    assert jnp.allclose(out_small, _reference(x_small, w1, b1, w2, b2),
                        atol=1e-5, rtol=1e-5)

    # Non-multiple batch with a small tile: exercises the batch-tiled grid
    # (3 parallel steps) plus zero-padding/slicing of the ragged last tile.
    x_big = jax.random.normal(k_x2, (300, input_dim), jnp.float32)
    out_big = jax.block_until_ready(
        simple_model_forward(x_big, w1, b1, w2, b2, block_b=128))
    assert out_big.shape == (300, output_dim)
    assert jnp.allclose(out_big, _reference(x_big, w1, b1, w2, b2),
                        atol=1e-5, rtol=1e-5)

    print("KERNEL_OK")
</pallas_src>

<mosaic_0001>
module attributes {stable_mosaic.version = 11 : i64} {
  func.func @_mlp_kernel(%arg0: i32, %arg1: memref<8x10xf32, #tpu.memory_space<vmem>>, %arg2: memref<10x20xf32, #tpu.memory_space<vmem>>, %arg3: memref<1x20xf32, #tpu.memory_space<vmem>>, %arg4: memref<20x2xf32, #tpu.memory_space<vmem>>, %arg5: memref<1x2xf32, #tpu.memory_space<vmem>>, %arg6: memref<8x2xf32, #tpu.memory_space<vmem>>) attributes {dimension_semantics = [#tpu.dimension_semantics<parallel>], iteration_bounds = array<i64: 1>, scalar_prefetch = 0 : i64, scratch_operands = 0 : i64, tpu.core_type = #tpu.core_type<tc>, window_params = [{transform_indices = @transform_0, window_bounds = array<i64: 8, 10>}, {pipeline_mode = #tpu.pipeline_mode<synchronous>, transform_indices = @transform_1, window_bounds = array<i64: 10, 20>}, {pipeline_mode = #tpu.pipeline_mode<synchronous>, transform_indices = @transform_2, window_bounds = array<i64: 1, 20>}, {pipeline_mode = #tpu.pipeline_mode<synchronous>, transform_indices = @transform_3, window_bounds = array<i64: 20, 2>}, {pipeline_mode = #tpu.pipeline_mode<synchronous>, transform_indices = @transform_4, window_bounds = array<i64: 1, 2>}, {transform_indices = @transform_5, window_bounds = array<i64: 8, 2>}]} {
    %c0 = arith.constant 0 : index
    %c0_0 = arith.constant 0 : index
    %0 = vector.load %arg1[%c0, %c0_0] : memref<8x10xf32, #tpu.memory_space<vmem>>, vector<8x10xf32>
    %c0_1 = arith.constant 0 : index
    %c0_2 = arith.constant 0 : index
    %1 = vector.load %arg2[%c0_1, %c0_2] : memref<10x20xf32, #tpu.memory_space<vmem>>, vector<10x20xf32>
    %cst = arith.constant dense<0.000000e+00> : vector<8x20xf32>
    %2 = tpu.matmul %0, %1, %cst {dimension_numbers = #tpu.dot_dimension_numbers<[1], [0], [0], [1], [0, 0, 1, 1], [], []>} : vector<8x10xf32>, vector<10x20xf32>, vector<8x20xf32> -> vector<8x20xf32>
    %c0_3 = arith.constant 0 : index
    %c0_4 = arith.constant 0 : index
    %3 = vector.load %arg3[%c0_3, %c0_4] : memref<1x20xf32, #tpu.memory_space<vmem>>, vector<1x20xf32>
    %4 = vector.broadcast %3 : vector<1x20xf32> to vector<8x20xf32>
    %5 = arith.addf %2, %4 : vector<8x20xf32>
    %cst_5 = arith.constant 0.000000e+00 : f32
    %6 = vector.broadcast %cst_5 : f32 to vector<8x20xf32>
    %7 = arith.maximumf %5, %6 : vector<8x20xf32>
    %c0_6 = arith.constant 0 : index
    %c0_7 = arith.constant 0 : index
    %8 = vector.load %arg4[%c0_6, %c0_7] : memref<20x2xf32, #tpu.memory_space<vmem>>, vector<20x2xf32>
    %cst_8 = arith.constant dense<0.000000e+00> : vector<8x2xf32>
    %9 = tpu.matmul %7, %8, %cst_8 {dimension_numbers = #tpu.dot_dimension_numbers<[1], [0], [0], [1], [0, 0, 1, 1], [], []>} : vector<8x20xf32>, vector<20x2xf32>, vector<8x2xf32> -> vector<8x2xf32>
    %c0_9 = arith.constant 0 : index
    %c0_10 = arith.constant 0 : index
    %10 = vector.load %arg5[%c0_9, %c0_10] : memref<1x2xf32, #tpu.memory_space<vmem>>, vector<1x2xf32>
    %11 = vector.broadcast %10 : vector<1x2xf32> to vector<8x2xf32>
    %12 = arith.addf %9, %11 : vector<8x2xf32>
    %c0_11 = arith.constant 0 : index
    %c0_12 = arith.constant 0 : index
    %13 = vector.load %arg6[%c0_11, %c0_12] : memref<8x2xf32, #tpu.memory_space<vmem>>, vector<8x2xf32>
    tpu.vector_store %arg6[%c0_11, %c0_12], %12 {strides = array<i32>} : memref<8x2xf32, #tpu.memory_space<vmem>>, vector<8x2xf32>,
    return
  }
  func.func @transform_0(%arg0: i32) -> (i32, i32) {
    %c0_i32 = arith.constant 0 : i32
    %c0_i32_0 = arith.constant 0 : i32
    return %arg0, %c0_i32 : i32, i32
  }
  func.func @transform_1(%arg0: i32) -> (i32, i32) {
    %c0_i32 = arith.constant 0 : i32
    %c0_i32_0 = arith.constant 0 : i32
    %c0_i32_1 = arith.constant 0 : i32
    return %c0_i32, %c0_i32_0 : i32, i32
  }
  func.func @transform_2(%arg0: i32) -> (i32, i32) {
    %c0_i32 = arith.constant 0 : i32
    %c0_i32_0 = arith.constant 0 : i32
    %c0_i32_1 = arith.constant 0 : i32
    return %c0_i32, %c0_i32_0 : i32, i32
  }
  func.func @transform_3(%arg0: i32) -> (i32, i32) {
    %c0_i32 = arith.constant 0 : i32
    %c0_i32_0 = arith.constant 0 : i32
    %c0_i32_1 = arith.constant 0 : i32
    return %c0_i32, %c0_i32_0 : i32, i32
  }
  func.func @transform_4(%arg0: i32) -> (i32, i32) {
    %c0_i32 = arith.constant 0 : i32
    %c0_i32_0 = arith.constant 0 : i32
    %c0_i32_1 = arith.constant 0 : i32
    return %c0_i32, %c0_i32_0 : i32, i32
  }
  func.func @transform_5(%arg0: i32) -> (i32, i32) {
    %c0_i32 = arith.constant 0 : i32
    %c0_i32_0 = arith.constant 0 : i32
    return %arg0, %c0_i32 : i32, i32
  }
}

</mosaic_0001>

<bundles_post_ra>
// kernel: tpu_custom_call.1
= control target key start
LH: loop header
LB: loop body
LE: loop exit
PB: predicated region body
PF: predicated region fallthrough
CT: control target
= control target key end

     0   :  { %vm34_vm0 = vcmask 1041408   ;;  %v243_v0 = vmov 0.0|0.0   ;;  %vm244_vm1 = vmmov 1   ;;  %vm245_vm3 = vmmov 0   ;;  %s304_s1 = inlined_call_operand.vmem [shape: f32[10,20], index: 1, kind: input, shape index: {}]   ;;  %s305_s0 = inlined_call_operand.vmem [shape: f32[8,10], index: 0, kind: input, shape index: {}]   ;;  %s306_s3 = inlined_call_operand.vmem [shape: f32[20,2], index: 3, kind: input, shape index: {}]   ;;  %s307_s2 = inlined_call_operand.vmem [shape: f32[1,20], index: 2, kind: input, shape index: {}]   ;;  %s308_s4 = inlined_call_operand.vmem [shape: f32[1,2], index: 4, kind: input, shape index: {}]   ;;  %s309_s5 = inlined_call_operand.vmem [shape: f32[8,2], index: 5, kind: output, shape index: {}]  }
   0x1   :  { %232 = vmatprep.subr.bf16.mxu0 %v243_v0  ;;  %v21_v1 = vld [vmem:[%s304_s1] sm:$0xff]  ;;  %v22_v2 = vld [vmem:[%s304_s1 + $0x8] sm:$0x3]  ;;  %vm234_vm2 = vmpackc.low %vm34_vm0, %vm244_vm1  ;;  %236 = vmatprep.subr.bf16.mxu1 %v243_v0  ;;  %v246_v4 = vmov 0.0   ;;  %vm30_vm4 = vcmask 80896   ;;  %vm123_vm5 = vcmask 1043456  }
   0x2   :  { %v233_v3 = vpack.c.bf16 %v22_v2, %v21_v1  ;;  %220 = vmatprep.mubr.msk.f32.mxu0 %vm245_vm3, %v246_v4  ;;  %229 = vmatprep.mubr.msk.f32.mxu1 %vm245_vm3, %v246_v4  ;;  %v20_v5 = vld [vmem:[%s305_s0] sm:$0xff]  ;;  %v110_v7 = vld [vmem:[%s306_s3 + $0x8] sm:$0xff]  ;;  %v111_v9 = vld [vmem:[%s306_s3 + $0x10] sm:$0xf]  ;;  %vm119_vm6 = vcmask 162816   ;;  %vm197_vm7 = vcmask 15360  }
   0x3   :  { %v109_v6 = vld [vmem:[%s306_s3] sm:$0xff] }
   0x4   :  { %235 = vmatpush3.bf16.msk.msra.mxu0 %vm234_vm2, %v233_v3  ;;  %v237_v8 = vpack.c.bf16 %v110_v7, %v109_v6  ;;  %v203_v10 = vld [vmem:[%s307_s2] ss:$0 sm:$0xff] }
   0x5   :  { %v206_v15 = vld [vmem:[%s308_s4] ss:$0 sm:$0xff] }
   0x6   :  { %238 = vmatpush3.bf16.msra.mxu1 %v237_v8 }
   0x7   :  { %221 = vmatmul.mubr.msk.f32.vlgmr.msra.gmra.mrb[0].mxu0 %vm30_vm4, %v20_v5  ;;  %227 = vmatprep.subr.mxu1 %v246_v4 }
   0xa   :  { %228 = vmatpush3.msk.msra.mxu1 %vm123_vm5, %v111_v9 }
  0xda   :  { %v104_v11 = vpop.f32.mrb[0].mxu0 }
  0xdb   :  { %v105_v12 = vadd.f32 %v203_v10, %v104_v11  ;;  %v222_v13 = vpop.f32.mrb[1].mxu0 }
  0xdd   :  { %v108_v14 = vmax.f32 %v105_v12, 0.0 }
  0xdf   :  { %230 = vmatmul.mubr.msk.f32.vlgmr.msra.gmra.mrb[0].mxu1 %vm119_vm6, %v108_v14 }
 0x1b2   :  { %v193_v16 = vpop.f32.mrb[0].mxu1 }
 0x1b3   :  { %v194_v17 = vadd.f32 %v206_v15, %v193_v16  ;;  %v231_v18 = vpop.f32.mrb[1].mxu1 }
 0x1b5   :  { %198 = vst.msk [vmem:[%s309_s5] sm:$0xff] %vm197_vm7, %v194_v17 }

</bundles_post_ra>
